<compile_context>
chip_gen: v7x
topology: tpu7x:2x2x1
jax: 0.10.0
libtpu: 0.0.40
codegen_flags: <defaults>
</compile_context>

<pallas_src>
import functools
import math

import jax
import jax.numpy as jnp
from jax import lax
from jax.experimental import pallas as pl
from jax.experimental.pallas import tpu as pltpu

N_EMBD = 192  # C (must match the module's n_embd)
LANE = 128    # TPU lane width; the packed [k|q|v] weight is padded to a multiple of this


def _head_kernel(x_ref, w_ref, o_ref, *, approx_recip):
    # x_ref: (bb, T, C)   activations (bf16 on the fast path, f32 on the ref path)
    # w_ref: (C, Np)      packed [k | q*scale | v | zero-pad] weights, Np = 128
    # o_ref: (bb, T, H)   output in the compute dtype (only the H useful lanes)
    x = x_ref[...]
    w = w_ref[...]
    bb, T, C = x.shape
    H = o_ref.shape[2]
    compute_dtype = x.dtype

    # Fused K/Q/V projection: one (bb*T, C) @ (C, 128) MXU pass, f32 accumulation,
    # then a single downcast of the whole kqv tensor to the compute dtype.
    x2 = x.reshape(bb * T, C)
    kqv = jnp.dot(x2, w, preferred_element_type=jnp.float32)
    kqv = kqv.astype(compute_dtype).reshape(bb, T, w.shape[1])
    k = kqv[:, :, 0:H]
    q = kqv[:, :, H:2 * H]        # C**-0.5 scale already folded into these columns
    v = kqv[:, :, 2 * H:3 * H]

    # Attention scores (scale pre-applied via the packed query weights).
    wei = jnp.einsum('bqd,bkd->bqk', q, k, preferred_element_type=jnp.float32)

    # Causal mask via broadcast compare of (T,1) row iota vs (1,T) col iota.
    row = lax.broadcasted_iota(jnp.int32, (T, 1), 0)
    col = lax.broadcasted_iota(jnp.int32, (1, T), 1)
    causal = (col <= row)[None, :, :]                     # (1, T, T) bool
    wei = jnp.where(causal, wei, -jnp.inf)

    # Numerically-stable softmax, all elementwise math in f32.
    m = jnp.max(wei, axis=-1, keepdims=True)
    p = jnp.exp(wei - m)
    denom = jnp.sum(p, axis=-1, keepdims=True)
    if approx_recip:
        p = p * pl.reciprocal(denom, approx=True)         # EUP vrcp slot; VALU stays free
    else:
        p = p / denom                                     # exact divide for the f32 path

    # TODO(synk): training-mode dropout on `p` not implemented (eval-mode identity).

    out = jnp.einsum('bqk,bkd->bqd', p.astype(compute_dtype), v,
                     preferred_element_type=jnp.float32)
    o_ref[...] = out.astype(o_ref.dtype)


def _pack_qkv_weights(w_key, w_query, w_value, scale, pad_to=LANE):
    """Concatenate [key | query*scale | value] into a (C, 3H) weight and zero-pad the
    column dimension once up to a multiple of `pad_to` lanes (single MXU N-tile)."""
    packed = jnp.concatenate([w_key, w_query * scale, w_value], axis=1)
    total = packed.shape[1]
    padded = ((total + pad_to - 1) // pad_to) * pad_to
    if padded != total:
        packed = jnp.pad(packed, ((0, 0), (0, padded - total)))
    return packed


def _pick_batch_block(B, T):
    """Largest divisor of B such that:
       * bb*T rows amortize per-grid-step overhead (target ~2048 rows),
       * the (bb, T, T) f32 score tile stays under ~6 MiB (keeps the whole per-step
         working set well inside v7x's scoped VMEM),
       * grid = B // bb is at least 2 so the 'parallel' batch axis can shard across
         both v7x TensorCores."""
    target_rows = 2048
    cap_rows = max(1, target_rows // max(T, 1))
    cap_mem = max(1, (6 * 1024 * 1024) // max(T * T * 4, 1))
    cap_cores = max(1, B // 2)
    cap = max(1, min(cap_rows, cap_mem, cap_cores))
    bb = 1
    for d in range(1, B + 1):
        if B % d == 0 and d <= cap:
            bb = d
    return bb


def head_forward(x, w_key, w_query, w_value, *, use_bf16=True):
    """x: (B, T, C); w_*: (C, H) pre-transposed Linear weights.
    Returns (B, T, H) in the compute dtype (bf16 by default, f32 if use_bf16=False)."""
    B, T, C = x.shape
    H = w_key.shape[1]
    assert C == w_key.shape[0] == w_query.shape[0] == w_value.shape[0]
    assert w_query.shape[1] == H and w_value.shape[1] == H

    w_packed = _pack_qkv_weights(w_key, w_query, w_value, scale=C ** (-0.5))
    Np = w_packed.shape[1]

    compute_dtype = jnp.bfloat16 if use_bf16 else x.dtype
    x_in = x.astype(compute_dtype)
    w_in = w_packed.astype(compute_dtype)

    bb = _pick_batch_block(B, T)
    grid = (B // bb,)

    kernel = functools.partial(_head_kernel, approx_recip=use_bf16)

    out = pl.pallas_call(
        kernel,
        out_shape=jax.ShapeDtypeStruct((B, T, H), compute_dtype),
        grid_spec=pltpu.PrefetchScalarGridSpec(
            num_scalar_prefetch=0,
            grid=grid,
            in_specs=[
                pl.BlockSpec((bb, T, C), lambda b: (b, 0, 0)),
                pl.BlockSpec((C, Np), lambda b: (0, 0)),
            ],
            out_specs=pl.BlockSpec((bb, T, H), lambda b: (b, 0, 0)),
        ),
        compiler_params=pltpu.CompilerParams(
            dimension_semantics=("parallel",),
            vmem_limit_bytes=32 * 1024 * 1024,
        ),
    )(x_in, w_in)
    return out


def head_reference(x, w_key, w_query, w_value):
    """Pure-JAX f32 reference matching the PyTorch forward (eval mode)."""
    B, T, C = x.shape
    k = x @ w_key
    q = x @ w_query
    v = x @ w_value
    wei = (q @ jnp.swapaxes(k, -2, -1)) * (C ** (-0.5))
    tril = jnp.tril(jnp.ones((T, T), dtype=bool))
    wei = jnp.where(tril, wei, -jnp.inf)
    wei = jax.nn.softmax(wei, axis=-1)
    return wei @ v


if __name__ == "__main__":
    key = jax.random.PRNGKey(0)
    B, T, C, HEAD_SIZE = 2, 8, N_EMBD, 32

    kx, kk, kq, kv = jax.random.split(key, 4)
    x = jax.random.normal(kx, (B, T, C), dtype=jnp.float32)

    # PyTorch Linear default init U(-1/sqrt(C), 1/sqrt(C)), stored transposed as (C, H).
    bound = 1.0 / math.sqrt(C)
    w_key = jax.random.uniform(kk, (C, HEAD_SIZE), jnp.float32, -bound, bound)
    w_query = jax.random.uniform(kq, (C, HEAD_SIZE), jnp.float32, -bound, bound)
    w_value = jax.random.uniform(kv, (C, HEAD_SIZE), jnp.float32, -bound, bound)

    ref = head_reference(x, w_key, w_query, w_value)

    # 1) f32 path (exact divide in softmax): tight functional check of the packed
    #    projection / folded scale / mask / softmax / narrow output store.
    out_f32 = jax.block_until_ready(
        head_forward(x, w_key, w_query, w_value, use_bf16=False))
    assert out_f32.shape == (B, T, HEAD_SIZE)
    assert out_f32.dtype == jnp.float32
    assert jnp.allclose(out_f32, ref, atol=5e-3, rtol=5e-3), "f32 path mismatch vs reference"

    # 2) Default bf16-MXU path (f32 accumulation + f32 softmax, bf16 output).
    out = jax.block_until_ready(head_forward(x, w_key, w_query, w_value))
    assert out.shape == (B, T, HEAD_SIZE)
    assert out.dtype == jnp.bfloat16
    assert jnp.allclose(out.astype(jnp.float32), ref, atol=3e-2, rtol=3e-2), \
        "bf16 path mismatch vs reference"

    print("KERNEL_OK")
</pallas_src>

<mosaic_0001>
module attributes {stable_mosaic.version = 11 : i64} {
  func.func @_head_kernel(%arg0: i32, %arg1: memref<1x8x192xf32, #tpu.memory_space<vmem>>, %arg2: memref<192x128xf32, #tpu.memory_space<vmem>>, %arg3: memref<1x8x32xf32, #tpu.memory_space<vmem>>) attributes {dimension_semantics = [#tpu.dimension_semantics<parallel>], iteration_bounds = array<i64: 2>, scalar_prefetch = 0 : i64, scratch_operands = 0 : i64, tpu.core_type = #tpu.core_type<tc>, window_params = [{transform_indices = @transform_0, window_bounds = array<i64: 1, 8, 192>}, {pipeline_mode = #tpu.pipeline_mode<synchronous>, transform_indices = @transform_1, window_bounds = array<i64: 192, 128>}, {transform_indices = @transform_2, window_bounds = array<i64: 1, 8, 32>}]} {
    %c0 = arith.constant 0 : index
    %c0_0 = arith.constant 0 : index
    %c0_1 = arith.constant 0 : index
    %0 = vector.load %arg1[%c0, %c0_0, %c0_1] : memref<1x8x192xf32, #tpu.memory_space<vmem>>, vector<1x8x192xf32>
    %c0_2 = arith.constant 0 : index
    %c0_3 = arith.constant 0 : index
    %1 = vector.load %arg2[%c0_2, %c0_3] : memref<192x128xf32, #tpu.memory_space<vmem>>, vector<192x128xf32>
    %2 = vector.shape_cast %0 : vector<1x8x192xf32> to vector<8x192xf32>
    %cst = arith.constant dense<0.000000e+00> : vector<8x128xf32>
    %3 = tpu.matmul %2, %1, %cst {dimension_numbers = #tpu.dot_dimension_numbers<[1], [0], [0], [1], [0, 0, 1, 1], [], []>} : vector<8x192xf32>, vector<192x128xf32>, vector<8x128xf32> -> vector<8x128xf32>
    %4 = vector.shape_cast %3 : vector<8x128xf32> to vector<1x8x128xf32>
    %5 = vector.extract_strided_slice %4 {offsets = [0, 0, 0], sizes = [1, 8, 32], strides = [1, 1, 1]} : vector<1x8x128xf32> to vector<1x8x32xf32>
    %6 = vector.extract_strided_slice %4 {offsets = [0, 0, 32], sizes = [1, 8, 32], strides = [1, 1, 1]} : vector<1x8x128xf32> to vector<1x8x32xf32>
    %7 = vector.extract_strided_slice %4 {offsets = [0, 0, 64], sizes = [1, 8, 32], strides = [1, 1, 1]} : vector<1x8x128xf32> to vector<1x8x32xf32>
    "tpu.trace_start"() <{level = 10 : i32, message = "bqd,bkd->bqk"}> : () -> ()
    %cst_4 = arith.constant dense<0.000000e+00> : vector<1x8x8xf32>
    %8 = tpu.matmul %6, %5, %cst_4 {dimension_numbers = #tpu.dot_dimension_numbers<[2], [2], [1], [1], [0, 0, 0, 1, 1, 1], [0], [0]>} : vector<1x8x32xf32>, vector<1x8x32xf32>, vector<1x8x8xf32> -> vector<1x8x8xf32>
    "tpu.trace_stop"() : () -> ()
    %9 = tpu.iota {dimensions = array<i32: 0>} : vector<8x1xi32>
    %10 = tpu.iota {dimensions = array<i32: 1>} : vector<1x8xi32>
    %11 = vector.broadcast %10 : vector<1x8xi32> to vector<8x8xi32>
    %12 = vector.broadcast %9 : vector<8x1xi32> to vector<8x8xi32>
    %13 = arith.cmpi sle, %11, %12 : vector<8x8xi32>
    %14 = vector.shape_cast %13 : vector<8x8xi1> to vector<1x8x8xi1>
    %cst_5 = arith.constant 0xFF800000 : f32
    %15 = vector.broadcast %cst_5 : f32 to vector<1x8x8xf32>
    %16 = arith.select %14, %8, %15 : vector<1x8x8xi1>, vector<1x8x8xf32>
    %cst_6 = arith.constant dense<0xFF800000> : vector<1x8xf32>
    %17 = vector.multi_reduction <maximumf>, %16, %cst_6 [2] : vector<1x8x8xf32> to vector<1x8xf32>
    %18 = vector.shape_cast %17 : vector<1x8xf32> to vector<1x8x1xf32>
    %19 = vector.broadcast %18 : vector<1x8x1xf32> to vector<1x8x8xf32>
    %20 = arith.subf %16, %19 : vector<1x8x8xf32>
    %21 = math.exp %20 : vector<1x8x8xf32>
    %cst_7 = arith.constant dense<0.000000e+00> : vector<1x8xf32>
    %22 = vector.multi_reduction <add>, %21, %cst_7 [2] : vector<1x8x8xf32> to vector<1x8xf32>
    %23 = vector.shape_cast %22 : vector<1x8xf32> to vector<1x8x1xf32>
    %24 = vector.broadcast %23 : vector<1x8x1xf32> to vector<1x8x8xf32>
    %25 = arith.divf %21, %24 : vector<1x8x8xf32>
    "tpu.trace_start"() <{level = 10 : i32, message = "bqk,bkd->bqd"}> : () -> ()
    %cst_8 = arith.constant dense<0.000000e+00> : vector<1x8x32xf32>
    %26 = tpu.matmul %25, %7, %cst_8 {dimension_numbers = #tpu.dot_dimension_numbers<[2], [1], [1], [2], [0, 0, 0, 1, 1, 2], [0], [0]>} : vector<1x8x8xf32>, vector<1x8x32xf32>, vector<1x8x32xf32> -> vector<1x8x32xf32>
    "tpu.trace_stop"() : () -> ()
    %c0_9 = arith.constant 0 : index
    %c0_10 = arith.constant 0 : index
    %c0_11 = arith.constant 0 : index
    %27 = vector.load %arg3[%c0_9, %c0_10, %c0_11] : memref<1x8x32xf32, #tpu.memory_space<vmem>>, vector<1x8x32xf32>
    tpu.vector_store %arg3[%c0_9, %c0_10, %c0_11], %26 {strides = array<i32>} : memref<1x8x32xf32, #tpu.memory_space<vmem>>, vector<1x8x32xf32>,
    return
  }
  func.func @transform_0(%arg0: i32) -> (i32, i32, i32) {
    %c0_i32 = arith.constant 0 : i32
    %c0_i32_0 = arith.constant 0 : i32
    %c0_i32_1 = arith.constant 0 : i32
    return %arg0, %c0_i32, %c0_i32_0 : i32, i32, i32
  }
  func.func @transform_1(%arg0: i32) -> (i32, i32) {
    %c0_i32 = arith.constant 0 : i32
    %c0_i32_0 = arith.constant 0 : i32
    %c0_i32_1 = arith.constant 0 : i32
    return %c0_i32, %c0_i32_0 : i32, i32
  }
  func.func @transform_2(%arg0: i32) -> (i32, i32, i32) {
    %c0_i32 = arith.constant 0 : i32
    %c0_i32_0 = arith.constant 0 : i32
    %c0_i32_1 = arith.constant 0 : i32
    return %arg0, %c0_i32, %c0_i32_0 : i32, i32, i32
  }
}

</mosaic_0001>

<bundles_post_ra>
// kernel: tpu_custom_call.1
= control target key start
LH: loop header
LB: loop body
LE: loop exit
PB: predicated region body
PF: predicated region fallthrough
CT: control target
= control target key end

     0   :  { %7 = vsyncpa [#allocation3], 0  ;;  %s1042_s0 = inlined_call_operand.hbm [shape: f32[2,8,192], index: 0, kind: input, shape index: {}]   ;;  %s1043_s1 = inlined_call_operand.hbm [shape: f32[192,128], index: 1, kind: input, shape index: {}]   ;;  %s1044_s2 = inlined_call_operand.hbm [shape: f32[2,8,32], index: 2, kind: output, shape index: {}]  }
   0x1   :  { %9 = vsyncpa [#allocation3 + $0x1], 0 }
   0x2   :  { %10 = vsyncpa [#allocation6], 0 }
   0x3   :  { %11 = vsyncpa [#allocation4], 0 }
   0x4   :  { %13 = vsyncpa [#allocation4 + $0x1], 0  ;;  %s835_s9 = smov 0   ;;  %s837_s10 = smov 0  }
   0x5   :  { %s839_s11 = smov 0   ;;  %s841_s12 = smov 0  }
   0x6 LB: > { %s856_s13 = sadd.s32 4294967295, %s808_s12   ;;  %s542_s14 = sadd.s32 4294967294, %s808_s12   ;;  %s808_s12 = sphi %s841_s12, %s1064_s12   ;;  %s804_s11 = sphi %s839_s11, %s1063_s11   ;;  %s800_s10 = sphi %s837_s10, %s1062_s10   ;;  %s796_s9 = sphi %s835_s9, %s1061_s9  }
   0x7   : > { %p39_p0 = scmp.ne.s32.totalorder %s800_s10, %s796_s9  ;;  %p1045_p1 = scmp.eq.s32.totalorder %s856_s13, 0 }
   0x8   : > { %p90_p3 = scmp.eq.s32.totalorder %s542_s14, 1  ;;  %p543_p5 = scmp.ge.s32.totalorder %s808_s12, 1 }
   0x9   : > { %p865_p4 = por %p1045_p1, %p39_p0  ;;  %p97_p7 = scmp.lt.s32.totalorder %s808_s12, 3 }
   0xa   : > { %p870_p6 = por %p90_p3, %p39_p0  ;;  %s810_s18 = smov [#allocation5]  }
   0xb   : > { %s1048_s15 = scalar_select %p865_p4, 1, 0 }
   0xc   : > { %s1049_s16 = scalar_select %p870_p6, 1, 0 }
   0xd   : > { %p875_p8 = pnand %p543_p5, %p97_p7  ;;  %s109_s19 = sshll.u32 %s810_s18, 4  ;;  %s879_s19 = int_to_ptr.vmem [resolvable:$true] %s109_s19 }
   0xe   : > { %s891_s21 = sadd.s32 1, %s808_s12   ;;  %s26_s22 = sadd.s32 1, %s804_s11 }
   0xf   : > { %s1050_s17 = scalar_select %p875_p8, 1, 0 }
  0x10   : > { %p620_p9 = pneg %p875_p8  ;;  %s23_s23 = ssub.s32 %s808_s12, %s891_s21 }
  0x11   : > { %s680_s26 = scalar_lea.hbm %s1043_s1, 3072 }
  0x12   : > { %p886_p11 = pnand %p620_p9, %p1045_p1  ;;  %p681_p12 = scmp.ne.s32.totalorder %s1043_s1, %s680_s26 }
  0x13   : > { %p687_p5 = scmp.lt.u32.totalorder %s680_s26, %s1043_s1 }
  0x14   : > { %p682_p13 = pneg %p886_p11 }
  0x16   : > { %p683_p0 = pnand %p682_p13, %p681_p12 }
  0x18   : > { %p684_p3 = pneg %p683_p0 }
  0x1a   : > { %p689_p7 = pnand %p687_p5, %p684_p3 }
  0x1c   : > { %692 = shalt.err (!%p689_p7)
}
  0x1d   : > { %s693_s3 = scalar_lea.vmem %s879_s19, 3072  ;;  %p701_p2 = scmp.lt.s32.totalorder %s879_s19, %s879_s19 }
  0x1e   : > { %p694_p9 = scmp.ne.s32.totalorder %s879_s19, %s693_s3  ;;  %p702_p6 = scmp.lt.s32.totalorder %s693_s3, %s693_s3 }
  0x20   : > { %p696_p10 = pnand %p694_p9, %p682_p13  ;;  %p703_p4 = por %p702_p6, %p701_p2 }
  0x22   : > { %p697_p1 = pneg %p696_p10 }
  0x24   : > { %p704_p8 = pnand %p703_p4, %p697_p1 }
  0x26   : > { %707 = shalt.err (!%p704_p8)
}
  0x27   : > { %s811_s4 = smov 128   ;;  %s812_s5 = smov 8  }
  0x28   : > { %623 = dma.hbm_to_vmem [thread:$0]  (!%p886_p11), %s1043_s1, 3072, %s879_s19, [#allocation6], %s811_s4, %s811_s4, %s812_s5  }
  0x29   : > { %p24_p2 = scmp.eq.s32.totalorder %s23_s23, 0  ;;  %p33_p1 = scmp.ne.s32.totalorder %s804_s11, %s800_s10 }
  0x2a   : > { %p34_p4 = scmp.eq.s32.totalorder %s808_s12, 0  ;;  %p633_p6 = scmp.lt.s32.totalorder %s808_s12, 2 }
  0x2b   : > { %s922_s8 = scalar_select %p24_p2, %s804_s11, %s26_s22  }
  0x2c   : > { %p35_p8 = por %p34_p4, %p33_p1  ;;  %p1052_p10 = scmp.eq.s32.totalorder %s856_s13, 1 }
  0x2d   : > { %s123_s18 = sand.u32 1, %s804_s11   ;;  %s561_s24 = sshll.u32 %s808_s12, 8 }
  0x2e   : > { %p926_p12 = por %p1052_p10, %p33_p1  ;;  %s546_s25 = sshll.u32 %s123_s18, 4 }
  0x2f   : > { %s935_s27 = scalar_lea.hbm %s1042_s0, %s561_s24  ;;  %s127_s19 = scalar_lea.vmem [#allocation2], %s546_s25 }
  0x30   : > { %s135_s22 = sshll.u32 %s127_s19, 4  ;;  %p937_p11 = pnand %p633_p6, %p35_p8  ;;  %s941_s22 = int_to_ptr.vmem [resolvable:$true] %s135_s22 }
  0x31   : > { %s124_s28 = scalar_lea.sflag [#allocation3], %s123_s18  ;;  %s708_s29 = scalar_lea.hbm %s935_s27, 256 }
  0x32   : > { %p709_p13 = scmp.ne.s32.totalorder %s935_s27, %s708_s29  ;;  %p710_p0 = pneg %p937_p11 }
  0x33   : > { %s713_s4 = scalar_lea.hbm %s1042_s0, 512  ;;  %p714_p7 = scmp.lt.u32.totalorder %s935_s27, %s1042_s0 }
  0x34   : > { %p711_p3 = pnand %p710_p0, %p709_p13  ;;  %p715_p9 = scmp.lt.u32.totalorder %s713_s4, %s708_s29 }
  0x35   : > { %p717_p1 = scmp.lt.u32.totalorder %s708_s29, %s935_s27 }
  0x36   : > { %p712_p5 = pneg %p711_p3  ;;  %p716_p2 = por %p715_p9, %p714_p7 }
  0x38   : > { %p718_p4 = por %p717_p1, %p716_p2 }
  0x3a   : > { %p719_p6 = pnand %p718_p4, %p712_p5 }
  0x3c   : > { %722 = shalt.err (!%p719_p6)
}
  0x3d   : > { %s723_s7 = scalar_lea.vmem %s941_s22, 256  ;;  %s813_s18 = smov [#allocation2]  }
  0x3e   : > { %p724_p8 = scmp.ne.s32.totalorder %s941_s22, %s723_s7  ;;  %s728_s24 = sshll.u32 %s813_s18, 4  ;;  %s729_s24 = int_to_ptr.vmem [resolvable:$false] %s728_s24 }
  0x3f   : > { %s730_s25 = scalar_lea.vmem %s729_s24, 512  ;;  %p731_p3 = scmp.lt.s32.totalorder %s941_s22, %s729_s24 }
  0x40   : > { %p726_p10 = pnand %p724_p8, %p710_p0  ;;  %p732_p7 = scmp.lt.s32.totalorder %s730_s25, %s723_s7 }
  0x42   : > { %p727_p13 = pneg %p726_p10  ;;  %p733_p9 = por %p732_p7, %p731_p3 }
  0x44   : > { %p734_p2 = pnand %p733_p9, %p727_p13 }
  0x46   : > { %737 = shalt.err (!%p734_p2)
}
  0x47   : > { %627 = dma.hbm_to_vmem [thread:$0]  (!%p937_p11), %s935_s27, 256, %s941_s22, %s124_s28  }
  0x48   : > { %p1055_p5 = scmp.ne.s32.totalorder %s1050_s17, 0 }
  0x49   : > { %s971_s20 = sand.u32 (!%p1055_p5), 1, %s800_s10   ;;  %p1056_p0 = scmp.ne.s32.totalorder (!%p1055_p5), %s1048_s15, 0 }
  0x4a   : > { %144 = sbr.rel (%p1055_p5) target bundleno = 1215 (0x4bf), region = 28  ;;  %s550_s26 = sshll.u32 (!%p1055_p5), %s971_s20, 4 }
  0x4b   : > { %s147_s19 = scalar_lea.sflag (!%p1055_p5), [#allocation3], %s971_s20  ;;  %s975_s29 = scalar_lea.vmem (!%p1055_p5), [#allocation2], %s550_s26 }
  0x51   : > { %783 = dma.done.wait (%p1056_p0), %s147_s19, 256  }
  0x52   : > { %785 = vsyncadd (%p1056_p0), %s147_s19, 4294967040  ;;  %p1057_p11 = scmp.eq.s32.totalorder %s856_s13, 0 }
  0x54   : > { %787 = dma.done.wait (%p1057_p11), [#allocation6], 3072   ;;  %p1058_p1 = pmov %p1057_p11 }
  0x55   : > { %v814_v0 = vmov 0.0|0.0   ;;  %v177_v1 = vld [vmem:[#allocation5] sm:$0xff]  ;;  %v178_v2 = vld [vmem:[#allocation5 + $0x8] sm:$0xff]  ;;  %v179_v3 = vld [vmem:[#allocation5 + $0x10] sm:$0xff]  ;;  %vm201_vm0 = vcmask 523264   ;;  %v815_v39 = vmov 0.0   ;;  %v353_v43 = vlaneseq }
  0x56   : > { %789 = vsyncadd (%p1058_p1), [#allocation6], 4294964224  ;;  %576 = vmatprep.subr.bf16.mxu0 %v814_v0  ;;  %v577_v4 = vpack.c.bf16 %v178_v2, %v177_v1  ;;  %v180_v5 = vld [vmem:[#allocation5 + $0x18] sm:$0xff]  ;;  %v181_v7 = vld [vmem:[#allocation5 + $0x20] sm:$0xff]  ;;  %566 = vmatprep.subr.mxu1 %v815_v39  ;;  %vm816_vm1 = vmmov 0   ;;  %vm278_vm2 = vcmask 261120  }
  0x57   : > { %v580_v6 = vpack.c.bf16 %v180_v5, %v179_v3  ;;  %v182_v8 = vld [vmem:[#allocation5 + $0x28] sm:$0xff]  ;;  %v183_v10 = vld [vmem:[#allocation5 + $0x30] sm:$0xff]  ;;  %v184_v11 = vld [vmem:[#allocation5 + $0x38] sm:$0xff]  ;;  %568 = vmatprep.mubr.msk.f32.mxu1 %vm816_vm1, %v815_v39  ;;  %s817_s15 = smov 96   ;;  %v354_v44 = vshrl.u32 %v353_v43, 7  ;;  %v356_v45 = vand.u32 127, %v353_v43 }
  0x58   : > { %578 = vmatpush1.bf16.msra.mxu0 %v577_v4  ;;  %v583_v9 = vpack.c.bf16 %v182_v8, %v181_v7  ;;  %v176_v12 = vld [vmem:[%s975_s29 + $0x8] sm:$0xff]  ;;  %v586_v13 = vpack.c.bf16 %v184_v11, %v183_v10  ;;  %v185_v14 = vld [vmem:[#allocation5 + $0x40] sm:$0xff]  ;;  %v187_v17 = vld [vmem:[#allocation5 + $0x50] sm:$0xff]  ;;  %vm359_vm4 = vcmask 64512   ;;  %s818_s17 = smov 64   ;;  %s552_s27 = sshll.u32 %s971_s20, 3 }
  0x59   : > { %579 = vmatprep.subr.bf16.mxu0 %v814_v0  ;;  %553 = vmatprep.mubr.msk.f32.mxu0 %vm201_vm0, %v176_v12  ;;  %v186_v15 = vld [vmem:[#allocation5 + $0x48] sm:$0xff]  ;;  %v188_v18 = vld [vmem:[#allocation5 + $0x58] sm:$0xff]  ;;  %v189_v20 = vld [vmem:[#allocation5 + $0x60] sm:$0xff]  ;;  %vm357_vm3 = vcmp.le.s32.totalorder %v356_v45, %v354_v44  ;;  %s558_s22 = sshll.u32 %s856_s13, 7  ;;  %s174_s23 = scalar_lea.vmem [#allocation7], %s552_s27 }
  0x5a   : > { %v589_v16 = vpack.c.bf16 %v186_v15, %v185_v14  ;;  %v592_v19 = vpack.c.bf16 %v188_v18, %v187_v17  ;;  %v190_v21 = vld [vmem:[#allocation5 + $0x68] sm:$0xff]  ;;  %v191_v23 = vld [vmem:[#allocation5 + $0x70] sm:$0xff]  ;;  %v192_v24 = vld [vmem:[#allocation5 + $0x78] sm:$0xff]  ;;  %s462_s28 = sshll.u32 %s174_s23, 4  ;;  %s997_s4 = scalar_lea.hbm %s1044_s2, %s558_s22  ;;  %s999_s28 = int_to_ptr.vmem [resolvable:$true] %s462_s28 }
  0x5b   : > { %v595_v22 = vpack.c.bf16 %v190_v21, %v189_v20  ;;  %v598_v25 = vpack.c.bf16 %v192_v24, %v191_v23  ;;  %v193_v26 = vld [vmem:[#allocation5 + $0x80] sm:$0xff]  ;;  %v194_v27 = vld [vmem:[#allocation5 + $0x88] sm:$0xff]  ;;  %v195_v29 = vld [vmem:[#allocation5 + $0x90] sm:$0xff]  ;;  %s449_s5 = scalar_lea.sflag [#allocation4], %s971_s20  ;;  %s738_s6 = scalar_lea.vmem %s999_s28, 128 }
  0x5c   : > { %581 = vmatpush1.bf16.msra.mxu0 %v580_v6  ;;  %v601_v28 = vpack.c.bf16 %v194_v27, %v193_v26  ;;  %v196_v30 = vld [vmem:[#allocation5 + $0x98] sm:$0xff]  ;;  %v197_v32 = vld [vmem:[#allocation5 + $0xa0] sm:$0xff]  ;;  %v198_v33 = vld [vmem:[#allocation5 + $0xa8] sm:$0xff]  ;;  %p739_p4 = scmp.ne.s32.totalorder %s999_s28, %s738_s6  ;;  %s819_s13 = smov [#allocation7]  }
  0x5d   : > { %582 = vmatprep.subr.bf16.mxu0 %v814_v0  ;;  %v604_v31 = vpack.c.bf16 %v196_v30, %v195_v29  ;;  %v607_v34 = vpack.c.bf16 %v198_v33, %v197_v32  ;;  %v199_v35 = vld [vmem:[#allocation5 + $0xb0] sm:$0xff]  ;;  %v200_v36 = vld [vmem:[#allocation5 + $0xb8] sm:$0xff]  ;;  %s742_s7 = sshll.u32 %s819_s13, 4  ;;  %s743_s7 = int_to_ptr.vmem [resolvable:$false] %s742_s7 }
  0x5e   : > { %v610_v37 = vpack.c.bf16 %v200_v36, %v199_v35  ;;  %v175_v38 = vld [vmem:[%s975_s29] sm:$0xff]  ;;  %p740_p6 = pnand %p739_p4, %p926_p12  ;;  %s744_s18 = scalar_lea.vmem %s743_s7, 256 }
  0x5f   : > { %p745_p10 = scmp.lt.s32.totalorder %s999_s28, %s743_s7  ;;  %p746_p13 = scmp.lt.s32.totalorder %s744_s18, %s738_s6 }
  0x60   : > { %584 = vmatpush1.bf16.msra.mxu0 %v583_v9  ;;  %p741_p8 = pneg %p740_p6 }
  0x61   : > { %585 = vmatprep.subr.bf16.mxu0 %v814_v0  ;;  %p747_p3 = por %p746_p13, %p745_p10 }
  0x63   : > { %p748_p7 = pnand %p747_p3, %p741_p8 }
  0x64   : > { %587 = vmatpush1.bf16.msra.mxu0 %v586_v13 }
  0x65   : > { %588 = vmatprep.subr.bf16.mxu0 %v814_v0 }
  0x68   : > { %590 = vmatpush1.bf16.msra.mxu0 %v589_v16 }
  0x69   : > { %591 = vmatprep.subr.bf16.mxu0 %v814_v0 }
  0x6c   : > { %593 = vmatpush1.bf16.msra.mxu0 %v592_v19 }
  0x6d   : > { %594 = vmatprep.subr.bf16.mxu0 %v814_v0 }
  0x70   : > { %596 = vmatpush1.bf16.msra.mxu0 %v595_v22 }
  0x71   : > { %597 = vmatprep.subr.bf16.mxu0 %v814_v0 }
  0x74   : > { %599 = vmatpush1.bf16.msra.mxu0 %v598_v25 }
  0x75   : > { %600 = vmatprep.subr.bf16.mxu0 %v814_v0 }
  0x78   : > { %602 = vmatpush1.bf16.msra.mxu0 %v601_v28 }
  0x79   : > { %603 = vmatprep.subr.bf16.mxu0 %v814_v0 }
  0x7c   : > { %605 = vmatpush1.bf16.msra.mxu0 %v604_v31 }
  0x7d   : > { %606 = vmatprep.subr.bf16.mxu0 %v814_v0 }
  0x80   : > { %608 = vmatpush1.bf16.msra.mxu0 %v607_v34 }
  0x81   : > { %609 = vmatprep.subr.bf16.mxu0 %v814_v0 }
  0x84   : > { %611 = vmatpush1.bf16.msra.mxu0 %v610_v37 }
  0x87   : > { %270 = vmatmul.mubr.f32.vlgmr.msra.gmra.mrb[0].mxu0 %v175_v38 }
 0x15a   : > { %v271_v40 = vpop.f32.mrb[0].mxu0 }
 0x15b   : > { %276 = vrot.lane.b32.xlu0 %v271_v40, %s817_s15  ;;  %v273_v41 = vpop.f32.mrb[1].mxu0  ;;  %567 = vmatpush3.xpose.msk.msra.mxu1 %vm278_vm2, %v271_v40 }
 0x15c   : > { %571 = vmatprep.subr.mxu1 %v815_v39 }
 0x1cd   : > { %v277_v42 = vpop.permute.xlu0 %276 }
 0x1ce   : > { %569 = vmatmul.mubr.msk.f32.vlgmr.msra.gmra.mrb[0].mxu1 %vm278_vm2, %v277_v42 }
 0x1cf   : > { %573 = vmatprep.mubr.msk.f32.mxu1 %vm816_vm1, %v815_v39 }
 0x2a1   : > { %v349_v46 = vpop.f32.mrb[0].mxu1 }
 0x2a2   : > { %v358_v47 = vsel %vm357_vm3, %v349_v46, -inf  ;;  %v570_v48 = vpop.f32.mrb[1].mxu1 }
 0x2a3   : > { %v360_v49 = vsel %vm359_vm4, %v358_v47, -inf }
 0x2a4   : > { %361 = vmax.xlane.f32.xlu0 %v360_v49 }
 0x331   : > { %v362_v50 = vpop.xlane.xlu0 %361 }
 0x332   : > { %v363_v51 = vsub.f32 %v358_v47, %v362_v50 }
 0x334   : > { %v364_v52 = vmul.f32 1.442695, %v363_v51 }
 0x336   : > { %676 = vpow2.f32 %v364_v52 }
 0x340   : > { %v677_v53 = vpop.eup %676 }
 0x341   : > { %v366_v54 = vsel %vm359_vm4, %v677_v53, 0.0 }
 0x342   : > { %367 = vadd.xlane.f32.xlu1 %v366_v54 }
 0x353   : > { %371 = vrot.lane.b32.xlu1 %v271_v40, %s818_s17 }
 0x3cf   : > { %v368_v55 = vpop.xlane.xlu1 %367 }
 0x3d0   : > { %678 = vrcp.f32 %v368_v55 }
 0x3d3   : > { %v372_v56 = vpop.permute.xlu1 %371 }
 0x3d4   : > { %572 = vmatpush3.msra.mxu1 %v372_v56 }
 0x3da   : > { %v679_v57 = vpop.eup %678 }
 0x3db   : > { %v370_v58 = vmul.f32 %v679_v57, %v677_v53 }
 0x3dd   : > { %574 = vmatmul.mubr.msk.f32.vlgmr.msra.gmra.mrb[2].mxu1 %vm359_vm4, %v370_v58 }
 0x4b0   : > { %v443_v59 = vpop.f32.mrb[2].mxu1 }
 0x4b1   : > { %447 = vst.msk [vmem:[%s174_s23] sm:$0xff] %vm278_vm2, %v443_v59  ;;  %v575_v60 = vpop.f32.mrb[3].mxu1 }
 0x4b2   : > { %751 = shalt.err (!%p748_p7)
}
 0x4b3   : > { %s752_s24 = scalar_lea.hbm %s997_s4, 128  ;;  %s756_s26 = scalar_lea.hbm %s1044_s2, 256 }
 0x4b4   : > { %p753_p9 = scmp.ne.s32.totalorder %s997_s4, %s752_s24  ;;  %p757_p0 = scmp.lt.u32.totalorder %s997_s4, %s1044_s2 }
 0x4b5   : > { %p758_p11 = scmp.lt.u32.totalorder %s756_s26, %s752_s24  ;;  %p760_p4 = scmp.lt.u32.totalorder %s752_s24, %s997_s4 }
 0x4b6   : > { %p754_p2 = pnand %p753_p9, %p926_p12 }
 0x4b7   : > { %p759_p1 = por %p758_p11, %p757_p0 }
 0x4b8   : > { %p755_p5 = pneg %p754_p2 }
 0x4b9   : > { %p761_p6 = por %p760_p4, %p759_p1 }
 0x4bb   : > { %p762_p8 = pnand %p761_p6, %p755_p5 }
 0x4bd   : > { %765 = shalt.err (!%p762_p8)
}
 0x4be   : > { %618 = dma.vmem_to_hbm [thread:$0]  (%p926_p12), %s999_s28, 128, %s997_s4, %s449_s5  }
 0x4bf PF: > { %s474_s15 = sand.u32 1, %s796_s9   ;;  %p1059_p10 = scmp.ne.s32.totalorder %s1049_s16, 0 }
 0x4c0   : > { %p1060_p13 = scmp.ge.s32.totalorder %s808_s12, 2  ;;  %s475_s17 = scalar_lea.sflag [#allocation4], %s474_s15 }
 0x4c2   : > { %p629_p3 = pnand %p1060_p13, %p1059_p10 }
 0x4c4   : > { %791 = dma.done.wait (!%p629_p3), %s475_s17, 128  }
 0x4c5   : > { %793 = vsyncadd (!%p629_p3), %s475_s17, 4294967168  ;;  %p16_p7 = scmp.ge.s32.totalorder %s891_s21, 4   ;;  %s1061_s9 = smov %s800_s10 }
 0x4c6   : > { %s1062_s10 = smov %s804_s11  ;;  %s1063_s11 = smov %s922_s8 }
 0x4c7   : > { %s1064_s12 = smov %s891_s21  ;;  %18 = sbr.rel (!%p16_p7) target bundleno = 6 (0x6), region = 77 }
 0x4ce   :  { %480 = vsyncpa [#allocation3], 1 }
 0x4cf   :  { %482 = vsyncpa [#allocation3 + $0x1], 1 }
 0x4d0   :  { %483 = vsyncpa [#allocation6], 1 }
 0x4d1   :  { %484 = vsyncpa [#allocation4], 1 }
 0x4d2   :  { %486 = vsyncpa [#allocation4 + $0x1], 1 }

</bundles_post_ra>
